<compile_context>
chip_gen: v5e
topology: v5e:2x2
jax: 0.10.0
libtpu: 0.0.40
codegen_flags: <defaults>
</compile_context>

<pallas_src>
import jax
import jax.numpy as jnp
from jax.experimental import pallas as pl
from jax.experimental.pallas import tpu as pltpu


def _round_up(x, m):
    return ((x + m - 1) // m) * m


def qnetwork_kernel(x_ref, w1_ref, b1_ref, w2_ref, b2_ref, w3_ref, b3_ref, o_ref):
    # Cast activations to the MXU compute dtype in-kernel (VPU cast is free; avoids an
    # extra HBM pad/cast pass in the wrapper).
    x = x_ref[...].astype(w1_ref.dtype)
    # fc1: bf16 MXU inputs, f32 accumulate; bias + ReLU in f32.
    h1 = jnp.dot(x, w1_ref[...], preferred_element_type=jnp.float32)
    h1 = jnp.maximum(h1 + b1_ref[...], 0.0)
    # fc2
    h2 = jnp.dot(h1.astype(w2_ref.dtype), w2_ref[...],
                 preferred_element_type=jnp.float32)
    h2 = jnp.maximum(h2 + b2_ref[...], 0.0)
    # fc3 -> (TB, action_size); partial last batch tile is masked by Pallas on store.
    out = jnp.dot(h2.astype(w3_ref.dtype), w3_ref[...],
                  preferred_element_type=jnp.float32)
    o_ref[...] = (out + b3_ref[...]).astype(o_ref.dtype)


def prepare_params(params, compute_dtype=jnp.bfloat16):
    """One-time parameter prep (cast weights to MXU dtype, biases to f32).

    Call once and reuse across forward calls so the per-call path is a single pallas_call.
    """
    return {
        "w1": params["w1"].astype(compute_dtype),
        "b1": params["b1"].astype(jnp.float32),
        "w2": params["w2"].astype(compute_dtype),
        "b2": params["b2"].astype(jnp.float32),
        "w3": params["w3"].astype(compute_dtype),
        "b3": params["b3"].astype(jnp.float32),
    }


def _choose_tb(B, tb_cap):
    """Batch tile: multiple of 8 (sublane), capped at tb_cap; keep >=2 grid steps once
    B > 8 so both v7x TensorCores get work under the 'parallel' batch axis."""
    if B <= 8:
        return 8
    half = _round_up(pl.cdiv(B, 2), 8)
    return max(8, min(tb_cap, half))


def qnetwork_forward(x, prepared, *, tb=4096):
    """x: [B, state_size] float32. prepared: output of prepare_params (weights [in, out])."""
    w1, b1 = prepared["w1"], prepared["b1"]
    w2, b2 = prepared["w2"], prepared["b2"]
    w3, b3 = prepared["w3"], prepared["b3"]

    B, state_size = x.shape
    action_size = w3.shape[1]

    TB = _choose_tb(B, tb)
    grid = (pl.cdiv(B, TB),)

    const2d = lambda i: (0, 0)  # weights/biases pinned: same block every step

    out = pl.pallas_call(
        qnetwork_kernel,
        out_shape=jax.ShapeDtypeStruct((B, action_size), jnp.float32),
        grid=grid,
        in_specs=[
            pl.BlockSpec((TB, state_size), lambda i: (i, 0)),  # x: streamed over batch
            pl.BlockSpec(w1.shape, const2d),
            pl.BlockSpec(b1.shape, const2d),
            pl.BlockSpec(w2.shape, const2d),
            pl.BlockSpec(b2.shape, const2d),
            pl.BlockSpec(w3.shape, const2d),
            pl.BlockSpec(b3.shape, const2d),
        ],
        out_specs=pl.BlockSpec((TB, action_size), lambda i: (i, 0)),
        compiler_params=pltpu.CompilerParams(
            dimension_semantics=("parallel",),     # shards batch steps across v7x's 2 TCs
            vmem_limit_bytes=32 * 1024 * 1024,     # covers TB=4096 f32 intermediates; v5e/v7x safe
        ),
    )(x, w1, b1, w2, b2, w3, b3)

    return out


def init_params(key, state_size, action_size):
    """Deterministic init mimicking PyTorch nn.Linear default U[-1/sqrt(fan_in), +...]."""
    def linear(key, fan_in, fan_out):
        kw, kb = jax.random.split(key)
        bound = 1.0 / jnp.sqrt(float(fan_in))
        w = jax.random.uniform(kw, (fan_in, fan_out), jnp.float32, -bound, bound)
        b = jax.random.uniform(kb, (1, fan_out), jnp.float32, -bound, bound)
        return w, b

    k1, k2, k3 = jax.random.split(key, 3)
    w1, b1 = linear(k1, state_size, 128)
    w2, b2 = linear(k2, 128, 64)
    w3, b3 = linear(k3, 64, action_size)
    return {"w1": w1, "b1": b1, "w2": w2, "b2": b2, "w3": w3, "b3": b3}


def qnetwork_ref(x, p, compute_dtype=jnp.bfloat16):
    """Pure-JAX reference using the same bf16-inputs / f32-accumulate numerics.

    Note: results differ from a pure-f32 PyTorch QNetwork at ~1e-3 relative because of the
    bf16 cast of activations/weights feeding the MXU (intentional; accumulation stays f32).
    """
    w1 = p["w1"].astype(compute_dtype)
    w2 = p["w2"].astype(compute_dtype)
    w3 = p["w3"].astype(compute_dtype)
    h1 = jnp.dot(x.astype(compute_dtype), w1, preferred_element_type=jnp.float32)
    h1 = jnp.maximum(h1 + p["b1"], 0.0)
    h2 = jnp.dot(h1.astype(compute_dtype), w2, preferred_element_type=jnp.float32)
    h2 = jnp.maximum(h2 + p["b2"], 0.0)
    out = jnp.dot(h2.astype(compute_dtype), w3, preferred_element_type=jnp.float32)
    return out + p["b3"]


if __name__ == "__main__":
    key = jax.random.PRNGKey(0)
    k_params, k_x1, k_x2 = jax.random.split(key, 3)

    state_size = 32
    action_size = 4
    params = init_params(k_params, state_size, action_size)
    prepared = prepare_params(params)   # one-time cast; reused across calls

    # Small batch (inference-style path, single grid step).
    x_small = jax.random.normal(k_x1, (8, state_size), jnp.float32)
    out_small = jax.block_until_ready(qnetwork_forward(x_small, prepared))
    ref_small = qnetwork_ref(x_small, params)
    assert out_small.shape == (8, action_size)
    assert jnp.allclose(out_small, ref_small, atol=2e-3, rtol=2e-3), "small-batch mismatch"

    # Larger, non-multiple batch: exercises >=2 grid steps + masked partial last tile.
    x_big = jax.random.normal(k_x2, (300, state_size), jnp.float32)
    out_big = jax.block_until_ready(qnetwork_forward(x_big, prepared))
    ref_big = qnetwork_ref(x_big, params)
    assert out_big.shape == (300, action_size)
    assert jnp.allclose(out_big, ref_big, atol=2e-3, rtol=2e-3), "big-batch mismatch"

    print("KERNEL_OK")
</pallas_src>

<mosaic_0001>
module attributes {stable_mosaic.version = 11 : i64} {
  func.func @qnetwork_kernel(%arg0: i32, %arg1: memref<8x32xf32, #tpu.memory_space<vmem>>, %arg2: memref<32x128xbf16, #tpu.memory_space<vmem>>, %arg3: memref<1x128xf32, #tpu.memory_space<vmem>>, %arg4: memref<128x64xbf16, #tpu.memory_space<vmem>>, %arg5: memref<1x64xf32, #tpu.memory_space<vmem>>, %arg6: memref<64x4xbf16, #tpu.memory_space<vmem>>, %arg7: memref<1x4xf32, #tpu.memory_space<vmem>>, %arg8: memref<8x4xf32, #tpu.memory_space<vmem>>) attributes {dimension_semantics = [#tpu.dimension_semantics<parallel>], iteration_bounds = array<i64: 1>, scalar_prefetch = 0 : i64, scratch_operands = 0 : i64, tpu.core_type = #tpu.core_type<tc>, window_params = [{transform_indices = @transform_0, window_bounds = array<i64: 8, 32>}, {pipeline_mode = #tpu.pipeline_mode<synchronous>, transform_indices = @transform_1, window_bounds = array<i64: 32, 128>}, {pipeline_mode = #tpu.pipeline_mode<synchronous>, transform_indices = @transform_2, window_bounds = array<i64: 1, 128>}, {pipeline_mode = #tpu.pipeline_mode<synchronous>, transform_indices = @transform_3, window_bounds = array<i64: 128, 64>}, {pipeline_mode = #tpu.pipeline_mode<synchronous>, transform_indices = @transform_4, window_bounds = array<i64: 1, 64>}, {pipeline_mode = #tpu.pipeline_mode<synchronous>, transform_indices = @transform_5, window_bounds = array<i64: 64, 4>}, {pipeline_mode = #tpu.pipeline_mode<synchronous>, transform_indices = @transform_6, window_bounds = array<i64: 1, 4>}, {transform_indices = @transform_7, window_bounds = array<i64: 8, 4>}]} {
    %c0 = arith.constant 0 : index
    %c0_0 = arith.constant 0 : index
    %0 = vector.load %arg1[%c0, %c0_0] : memref<8x32xf32, #tpu.memory_space<vmem>>, vector<8x32xf32>
    %1 = arith.truncf %0 : vector<8x32xf32> to vector<8x32xbf16>
    %c0_1 = arith.constant 0 : index
    %c0_2 = arith.constant 0 : index
    %2 = vector.load %arg2[%c0_1, %c0_2] : memref<32x128xbf16, #tpu.memory_space<vmem>>, vector<32x128xbf16>
    %cst = arith.constant dense<0.000000e+00> : vector<8x128xf32>
    %3 = tpu.matmul %1, %2, %cst {dimension_numbers = #tpu.dot_dimension_numbers<[1], [0], [0], [1], [0, 0, 1, 1], [], []>} : vector<8x32xbf16>, vector<32x128xbf16>, vector<8x128xf32> -> vector<8x128xf32>
    %c0_3 = arith.constant 0 : index
    %c0_4 = arith.constant 0 : index
    %4 = vector.load %arg3[%c0_3, %c0_4] : memref<1x128xf32, #tpu.memory_space<vmem>>, vector<1x128xf32>
    %5 = vector.broadcast %4 : vector<1x128xf32> to vector<8x128xf32>
    %6 = arith.addf %3, %5 : vector<8x128xf32>
    %cst_5 = arith.constant 0.000000e+00 : f32
    %7 = vector.broadcast %cst_5 : f32 to vector<8x128xf32>
    %8 = arith.maximumf %6, %7 : vector<8x128xf32>
    %9 = arith.truncf %8 : vector<8x128xf32> to vector<8x128xbf16>
    %c0_6 = arith.constant 0 : index
    %c0_7 = arith.constant 0 : index
    %10 = vector.load %arg4[%c0_6, %c0_7] : memref<128x64xbf16, #tpu.memory_space<vmem>>, vector<128x64xbf16>
    %cst_8 = arith.constant dense<0.000000e+00> : vector<8x64xf32>
    %11 = tpu.matmul %9, %10, %cst_8 {dimension_numbers = #tpu.dot_dimension_numbers<[1], [0], [0], [1], [0, 0, 1, 1], [], []>} : vector<8x128xbf16>, vector<128x64xbf16>, vector<8x64xf32> -> vector<8x64xf32>
    %c0_9 = arith.constant 0 : index
    %c0_10 = arith.constant 0 : index
    %12 = vector.load %arg5[%c0_9, %c0_10] : memref<1x64xf32, #tpu.memory_space<vmem>>, vector<1x64xf32>
    %13 = vector.broadcast %12 : vector<1x64xf32> to vector<8x64xf32>
    %14 = arith.addf %11, %13 : vector<8x64xf32>
    %cst_11 = arith.constant 0.000000e+00 : f32
    %15 = vector.broadcast %cst_11 : f32 to vector<8x64xf32>
    %16 = arith.maximumf %14, %15 : vector<8x64xf32>
    %17 = arith.truncf %16 : vector<8x64xf32> to vector<8x64xbf16>
    %c0_12 = arith.constant 0 : index
    %c0_13 = arith.constant 0 : index
    %18 = vector.load %arg6[%c0_12, %c0_13] : memref<64x4xbf16, #tpu.memory_space<vmem>>, vector<64x4xbf16>
    %cst_14 = arith.constant dense<0.000000e+00> : vector<8x4xf32>
    %19 = tpu.matmul %17, %18, %cst_14 {dimension_numbers = #tpu.dot_dimension_numbers<[1], [0], [0], [1], [0, 0, 1, 1], [], []>} : vector<8x64xbf16>, vector<64x4xbf16>, vector<8x4xf32> -> vector<8x4xf32>
    %c0_15 = arith.constant 0 : index
    %c0_16 = arith.constant 0 : index
    %20 = vector.load %arg7[%c0_15, %c0_16] : memref<1x4xf32, #tpu.memory_space<vmem>>, vector<1x4xf32>
    %21 = vector.broadcast %20 : vector<1x4xf32> to vector<8x4xf32>
    %22 = arith.addf %19, %21 : vector<8x4xf32>
    %c0_17 = arith.constant 0 : index
    %c0_18 = arith.constant 0 : index
    %23 = vector.load %arg8[%c0_17, %c0_18] : memref<8x4xf32, #tpu.memory_space<vmem>>, vector<8x4xf32>
    tpu.vector_store %arg8[%c0_17, %c0_18], %22 {strides = array<i32>} : memref<8x4xf32, #tpu.memory_space<vmem>>, vector<8x4xf32>,
    return
  }
  func.func @transform_0(%arg0: i32) -> (i32, i32) {
    %c0_i32 = arith.constant 0 : i32
    %c0_i32_0 = arith.constant 0 : i32
    return %arg0, %c0_i32 : i32, i32
  }
  func.func @transform_1(%arg0: i32) -> (i32, i32) {
    %c0_i32 = arith.constant 0 : i32
    %c0_i32_0 = arith.constant 0 : i32
    %c0_i32_1 = arith.constant 0 : i32
    return %c0_i32, %c0_i32_0 : i32, i32
  }
  func.func @transform_2(%arg0: i32) -> (i32, i32) {
    %c0_i32 = arith.constant 0 : i32
    %c0_i32_0 = arith.constant 0 : i32
    %c0_i32_1 = arith.constant 0 : i32
    return %c0_i32, %c0_i32_0 : i32, i32
  }
  func.func @transform_3(%arg0: i32) -> (i32, i32) {
    %c0_i32 = arith.constant 0 : i32
    %c0_i32_0 = arith.constant 0 : i32
    %c0_i32_1 = arith.constant 0 : i32
    return %c0_i32, %c0_i32_0 : i32, i32
  }
  func.func @transform_4(%arg0: i32) -> (i32, i32) {
    %c0_i32 = arith.constant 0 : i32
    %c0_i32_0 = arith.constant 0 : i32
    %c0_i32_1 = arith.constant 0 : i32
    return %c0_i32, %c0_i32_0 : i32, i32
  }
  func.func @transform_5(%arg0: i32) -> (i32, i32) {
    %c0_i32 = arith.constant 0 : i32
    %c0_i32_0 = arith.constant 0 : i32
    %c0_i32_1 = arith.constant 0 : i32
    return %c0_i32, %c0_i32_0 : i32, i32
  }
  func.func @transform_6(%arg0: i32) -> (i32, i32) {
    %c0_i32 = arith.constant 0 : i32
    %c0_i32_0 = arith.constant 0 : i32
    %c0_i32_1 = arith.constant 0 : i32
    return %c0_i32, %c0_i32_0 : i32, i32
  }
  func.func @transform_7(%arg0: i32) -> (i32, i32) {
    %c0_i32 = arith.constant 0 : i32
    %c0_i32_0 = arith.constant 0 : i32
    return %arg0, %c0_i32 : i32, i32
  }
}

</mosaic_0001>

<bundles_post_ra>
// kernel: tpu_custom_call.1
= control target key start
LH: loop header
LB: loop body
LE: loop exit
PB: predicated region body
PF: predicated region fallthrough
CT: control target
= control target key end

     0   :  { %vm49_vm0 = vcmask 261120   ;;  %vm187_vm1 = vcmask 523264   ;;  %vm204_vm2 = vcmask 31744   ;;  %s382_s1 = inlined_call_operand.vmem [shape: bf16[32,128], index: 1, kind: input, shape index: {}]   ;;  %s383_s0 = inlined_call_operand.vmem [shape: f32[8,32], index: 0, kind: input, shape index: {}]   ;;  %s384_s3 = inlined_call_operand.vmem [shape: bf16[128,64], index: 3, kind: input, shape index: {}]   ;;  %s385_s2 = inlined_call_operand.vmem [shape: f32[1,128], index: 2, kind: input, shape index: {}]   ;;  %s386_s4 = inlined_call_operand.vmem [shape: f32[1,64], index: 4, kind: input, shape index: {}]   ;;  %s387_s5 = inlined_call_operand.vmem [shape: bf16[64,4], index: 5, kind: input, shape index: {}]   ;;  %s388_s6 = inlined_call_operand.vmem [shape: f32[1,4], index: 6, kind: input, shape index: {}]   ;;  %s389_s7 = inlined_call_operand.vmem [shape: f32[8,4], index: 7, kind: output, shape index: {}]  }
   0x1   :  { %v269_v0 = vld [vmem:[%s382_s1 + $0x8] sm:$0xff]  ;;  %v277_v1 = vld [vmem:[%s384_s3 + $0x38] sm:$0xff]  ;;  %v268_v2 = vld [vmem:[%s382_s1] sm:$0xff] }
   0x2   :  { %59 = vmatpush.bf16.msra.mxu0 %v269_v0  ;;  %v27_v3 = vld [vmem:[%s383_s0] sm:$0xff]  ;;  %136 = vmatpush.bf16.msra.mxu1 %v277_v1  ;;  %v276_v4 = vld [vmem:[%s384_s3 + $0x30] sm:$0xff]  ;;  %v275_v6 = vld [vmem:[%s384_s3 + $0x28] sm:$0xff] }
   0x3   :  { %v28_v5 = vpack.c.bf16 %v27_v3, %v27_v3  ;;  %v274_v7 = vld [vmem:[%s384_s3 + $0x20] sm:$0xff]  ;;  %v273_v8 = vld [vmem:[%s384_s3 + $0x18] sm:$0xff]  ;;  %v272_v9 = vld [vmem:[%s384_s3 + $0x10] sm:$0xff] }
   0x4   :  { %v271_v10 = vld [vmem:[%s384_s3 + $0x8] sm:$0xff]  ;;  %v270_v11 = vld [vmem:[%s384_s3] sm:$0xff]  ;;  %v281_v12 = vld [vmem:[%s387_s5 + $0x18] sm:$0xff] }
   0x5   :  { %195 = vmatpush.bf16.msra.mxu2 %v281_v12  ;;  %v280_v13 = vld [vmem:[%s387_s5 + $0x10] sm:$0xff]  ;;  %v282_v14 = vld [vmem:[%s385_s2] ss:$0 sm:$0xff]  ;;  %v279_v20 = vld [vmem:[%s387_s5 + $0x8] sm:$0xff] }
   0x6   :  { %60 = vmatpush.bf16.msra.mxu0 %v268_v2  ;;  %137 = vmatpush.bf16.msra.mxu1 %v276_v4  ;;  %v278_v21 = vld [vmem:[%s387_s5] sm:$0xff] }
   0x7   :  { %v283_v22 = vld [vmem:[%s386_s4] ss:$0 sm:$0xff] }
   0x8   :  { %v284_v28 = vld [vmem:[%s388_s6] ss:$0 sm:$0xff] }
   0x9   :  { %218 = vmatmul.msk.bf16.vlgmr.msra.gmra.mxu0 %vm49_vm0, %v28_v5  ;;  %196 = vmatpush.bf16.msra.mxu2 %v280_v13 }
   0xa   :  { %138 = vmatpush.bf16.msra.mxu1 %v275_v6 }
   0xd   :  { %197 = vmatpush.bf16.msra.mxu2 %v279_v20 }
   0xe   :  { %139 = vmatpush.bf16.msra.mxu1 %v274_v7 }
  0x11   :  { %198 = vmatpush.bf16.msra.mxu2 %v278_v21 }
  0x12   :  { %140 = vmatpush.bf16.msra.mxu1 %v273_v8 }
  0x16   :  { %141 = vmatpush.bf16.msra.mxu1 %v272_v9 }
  0x1a   :  { %142 = vmatpush.bf16.msra.mxu1 %v271_v10 }
  0x1e   :  { %143 = vmatpush.bf16.msra.mxu1 %v270_v11 }
  0x86   :  { %v62_v15 = vpop.f32.mrf.mxu0 }
  0x87   :  { %v63_v16 = vadd.f32 %v282_v14, %v62_v15 }
  0x89   :  { %v66_v17 = vmax.f32 %v63_v16, 0.0 }
  0x8b   :  { %v67_v18 = vpack.c.bf16 %v66_v17, %v66_v17 }
  0x8d   :  { %144 = vmatmul.bf16.vlgmr.msra.gmra.mxu1 %v67_v18 }
  0x8e   :  { %v64_v19 = vpop.f32.mrf.mxu0 }
 0x10a   :  { %v145_v23 = vpop.f32.mrf.mxu1 }
 0x10b   :  { %v146_v24 = vadd.f32 %v283_v22, %v145_v23 }
 0x10d   :  { %v149_v25 = vmax.f32 %v146_v24, 0.0 }
 0x10f   :  { %v150_v26 = vpack.c.bf16 %v149_v25, %v149_v25 }
 0x111   :  { %267 = vmatmul.msk.bf16.vlgmr.msra.gmra.mxu2 %vm187_vm1, %v150_v26 }
 0x112   :  { %v147_v27 = vpop.f32.mrf.mxu1 }
 0x194   :  { %v200_v29 = vpop.f32.mrf.mxu2 }
 0x195   :  { %v201_v30 = vadd.f32 %v284_v28, %v200_v29 }
 0x197   :  { %205 = vst.msk [vmem:[%s389_s7] sm:$0xff] %vm204_vm2, %v201_v30 }
 0x19c   :  { %v202_v31 = vpop.f32.mrf.mxu2 }

</bundles_post_ra>
